<compile_context>
chip_gen: v7x
topology: tpu7x:2x2x1
jax: 0.10.0
libtpu: 0.0.40
codegen_flags: <defaults>
</compile_context>

<pallas_src>
import functools

import jax
import jax.numpy as jnp
from jax import lax
from jax.experimental import pallas as pl
from jax.experimental.pallas import tpu as pltpu


def _pos_embed_kernel(col_ref, row_ref, out_ref, *, H_total):
    """One grid step: writes output rows [i*h_block*W, (i+1)*h_block*W).

    col_ref: (W, C)        full col_embed table (same block every step)
    row_ref: (h_block, C)  this step's slice of row_embed
    out_ref: (h_block*W, 2C)
    """
    W, C = col_ref.shape
    h_block = row_ref.shape[0]
    out_dtype = out_ref.dtype

    col = col_ref[...].astype(out_dtype)        # loop-invariant; load/cast once
    lane_dense_halves = (C % 128 == 0)          # trace-time constants
    sublane_aligned = (W % 8 == 0)

    if H_total % h_block == 0:
        h_valid = h_block                       # every block full: static trip count
    else:
        # Last (partial) block: only store the in-range rows.
        h_valid = jnp.minimum(h_block, H_total - pl.program_id(0) * h_block)

    def body(h, carry):
        start = h * W
        if sublane_aligned:
            start = pl.multiple_of(start, 8)
        right = jnp.broadcast_to(row_ref[pl.ds(h, 1), :].astype(out_dtype), (W, C))
        if lane_dense_halves:
            # Both halves are 128-lane aligned and dense: two unmasked stores.
            out_ref[pl.ds(start, W), :C] = col
            out_ref[pl.ds(start, W), C:] = right
        else:
            # Build the full 2C-wide row group in vregs (one lane concat on the
            # idle XLU) and issue a single dense store instead of two masked
            # vst.msk half-stores.
            out_ref[pl.ds(start, W), :] = jnp.concatenate([col, right], axis=-1)
        return carry

    lax.fori_loop(0, h_valid, body, 0)


def position_embedding_learned(col_weight, row_weight, *, out_dtype=None, h_block=None):
    """col_weight: (W, C) = col_embed.weight, row_weight: (H, C) = row_embed.weight.

    Returns pos of shape (H*W, 2*C), matching the PyTorch module's forward.
    """
    W, C = col_weight.shape
    H, C_row = row_weight.shape
    assert C == C_row, (C, C_row)
    assert col_weight.dtype == row_weight.dtype, (col_weight.dtype, row_weight.dtype)
    out_dtype = col_weight.dtype if out_dtype is None else jnp.dtype(out_dtype)
    C2 = 2 * C
    out_itemsize = jnp.dtype(out_dtype).itemsize
    in_itemsize = jnp.dtype(col_weight.dtype).itemsize

    # ---- choose H-chunking --------------------------------------------------
    # Small slab: single grid step (fits VMEM trivially; ~0.35 us/step overhead
    # would dominate).  Large slab: chunk H in multiples of 8 so the output
    # block stays ~2 MiB (=> <=4 MiB double-buffered, safe under the 32 MiB
    # scoped-VMEM default on v7x) and writeback overlaps across steps.
    if h_block is None:
        slab_bytes = H * W * C2 * out_itemsize
        if slab_bytes <= (2 << 20):
            h_block = H
        else:
            target_block_bytes = 2 << 20
            h_block = (target_block_bytes // (W * C2 * out_itemsize)) // 8 * 8
            h_block = max(8, h_block)
    h_block = min(int(h_block), H)
    if h_block < H and (h_block * W) % 8 != 0:
        # 8-align the chunk so (h_block*W) % 8 == 0 for any W (incl. 25/38/50).
        h_block = min(H, -(-h_block // 8) * 8)
    num_steps = pl.cdiv(H, h_block)

    kernel = functools.partial(_pos_embed_kernel, H_total=H)

    return pl.pallas_call(
        kernel,
        out_shape=jax.ShapeDtypeStruct((H * W, C2), out_dtype),
        grid=(num_steps,),
        in_specs=[
            pl.BlockSpec((W, C), lambda i: (0, 0)),         # col table (full, every step)
            pl.BlockSpec((h_block, C), lambda i: (i, 0)),   # this step's row-table slice
        ],
        out_specs=pl.BlockSpec((h_block * W, C2), lambda i: (i, 0)),
        cost_estimate=pl.CostEstimate(
            flops=0,
            transcendentals=0,
            bytes_accessed=H * W * C2 * out_itemsize + (H + W) * C * in_itemsize),
        compiler_params=pltpu.CompilerParams(
            dimension_semantics=("parallel",)),             # disjoint chunks → both TCs on v7x
    )(col_weight, row_weight)


def _reference(col_weight, row_weight):
    """Pure-JAX reference with the PyTorch module's semantics."""
    W, C = col_weight.shape
    H, _ = row_weight.shape
    left = jnp.broadcast_to(col_weight[None, :, :], (H, W, C))
    right = jnp.broadcast_to(row_weight[:, None, :], (H, W, C))
    return jnp.concatenate([left, right], axis=-1).reshape(H * W, 2 * C)


if __name__ == "__main__":
    key = jax.random.PRNGKey(0)
    k_row, k_col, k_x = jax.random.split(key, 3)

    # Module-consistent small demo: feature_size=(16, 16), num_pos_feats=64.
    H, W, C = 16, 16, 64
    B, CH = 2, 4
    row_w = jax.random.uniform(k_row, (H, C), dtype=jnp.float32)   # nn.init.uniform_
    col_w = jax.random.uniform(k_col, (W, C), dtype=jnp.float32)
    x = jax.random.normal(k_x, (B, CH, H, W), dtype=jnp.float32)   # NCHW; device-only in torch fwd

    pos = jax.block_until_ready(position_embedding_learned(col_w, row_w))
    assert pos.shape == (H * W, 2 * C), pos.shape
    assert bool(jnp.array_equal(pos, _reference(col_w, row_w))), "case 1 mismatch"

    # DETR-style non-8-aligned W + forced H-chunking: exercises the direct
    # (H*W, 2C) emission, the concat single-dense-store path, the multi-step
    # "parallel" grid and the partial last block.
    H2, W2, Cb = 19, 25, 64
    row_w2 = jax.random.uniform(jax.random.PRNGKey(1), (H2, Cb), dtype=jnp.float32)
    col_w2 = jax.random.uniform(jax.random.PRNGKey(2), (W2, Cb), dtype=jnp.float32)
    pos2 = jax.block_until_ready(position_embedding_learned(col_w2, row_w2, h_block=8))
    assert pos2.shape == (H2 * W2, 2 * Cb), pos2.shape
    assert bool(jnp.array_equal(pos2, _reference(col_w2, row_w2))), "case 2 mismatch"

    # Production num_pos_feats=128: exercises the lane-dense two-half-store path.
    H3, W3, Cc = 8, 8, 128
    row_w3 = jax.random.uniform(jax.random.PRNGKey(3), (H3, Cc), dtype=jnp.float32)
    col_w3 = jax.random.uniform(jax.random.PRNGKey(4), (W3, Cc), dtype=jnp.float32)
    pos3 = jax.block_until_ready(position_embedding_learned(col_w3, row_w3))
    assert bool(jnp.array_equal(pos3, _reference(col_w3, row_w3))), "case 3 mismatch"

    print("KERNEL_OK")
</pallas_src>

<mosaic_0001>
module attributes {stable_mosaic.version = 11 : i64} {
  func.func @_pos_embed_kernel(%arg0: i32, %arg1: memref<16x64xf32, #tpu.memory_space<vmem>>, %arg2: memref<16x64xf32, #tpu.memory_space<vmem>>, %arg3: memref<256x128xf32, #tpu.memory_space<vmem>>) attributes {dimension_semantics = [#tpu.dimension_semantics<parallel>], iteration_bounds = array<i64: 1>, scalar_prefetch = 0 : i64, scratch_operands = 0 : i64, tpu.core_type = #tpu.core_type<tc>, window_params = [{pipeline_mode = #tpu.pipeline_mode<synchronous>, transform_indices = @transform_0, window_bounds = array<i64: 16, 64>}, {transform_indices = @transform_1, window_bounds = array<i64: 16, 64>}, {transform_indices = @transform_2, window_bounds = array<i64: 256, 128>}]} {
    %c0 = arith.constant 0 : index
    %c0_0 = arith.constant 0 : index
    %0 = vector.load %arg1[%c0, %c0_0] : memref<16x64xf32, #tpu.memory_space<vmem>>, vector<16x64xf32>
    %c0_i32 = arith.constant 0 : i32
    %c16_i32 = arith.constant 16 : i32
    %1 = arith.addi %c0_i32, %c16_i32 : i32
    %c1_i32 = arith.constant 1 : i32
    scf.for %arg4 = %c0_i32 to %1 step %c1_i32  : i32 {
      %c16_i32_2 = arith.constant 16 : i32
      %2 = arith.muli %arg4, %c16_i32_2 : i32
      %3 = tpu.assume_multiple %2, 8 : i32
      %4 = arith.index_cast %arg4 : i32 to index
      %c0_3 = arith.constant 0 : index
      %5 = vector.load %arg2[%4, %c0_3] : memref<16x64xf32, #tpu.memory_space<vmem>>, vector<1x64xf32>
      %6 = vector.shape_cast %5 : vector<1x64xf32> to vector<1x64xf32>
      %7 = vector.broadcast %6 : vector<1x64xf32> to vector<16x64xf32>
      %8 = tpu.concatenate %0, %7 in 1 : vector<16x64xf32>, vector<16x64xf32> -> vector<16x128xf32>
      %9 = arith.index_cast %3 : i32 to index
      %c0_4 = arith.constant 0 : index
      %10 = vector.load %arg3[%9, %c0_4] : memref<256x128xf32, #tpu.memory_space<vmem>>, vector<16x128xf32>
      tpu.vector_store %arg3[%9, %c0_4], %8 {strides = array<i32>} : memref<256x128xf32, #tpu.memory_space<vmem>>, vector<16x128xf32>,
    }
    %c16_i32_1 = arith.constant 16 : i32
    return
  }
  func.func @transform_0(%arg0: i32) -> (i32, i32) {
    %c0_i32 = arith.constant 0 : i32
    %c0_i32_0 = arith.constant 0 : i32
    %c0_i32_1 = arith.constant 0 : i32
    return %c0_i32, %c0_i32_0 : i32, i32
  }
  func.func @transform_1(%arg0: i32) -> (i32, i32) {
    %c0_i32 = arith.constant 0 : i32
    %c0_i32_0 = arith.constant 0 : i32
    return %arg0, %c0_i32 : i32, i32
  }
  func.func @transform_2(%arg0: i32) -> (i32, i32) {
    %c0_i32 = arith.constant 0 : i32
    %c0_i32_0 = arith.constant 0 : i32
    return %arg0, %c0_i32 : i32, i32
  }
}

</mosaic_0001>

<bundles_post_ra>
// kernel: tpu_custom_call.1
= control target key start
LH: loop header
LB: loop body
LE: loop exit
PB: predicated region body
PF: predicated region fallthrough
CT: control target
= control target key end

     0   :  { %7 = vsyncpa [#allocation3], 0  ;;  %s253_s0 = inlined_call_operand.hbm [shape: f32[16,64], index: 0, kind: input, shape index: {}]   ;;  %s254_s1 = inlined_call_operand.hbm [shape: f32[16,64], index: 1, kind: input, shape index: {}]   ;;  %s255_s2 = inlined_call_operand.hbm [shape: f32[256,128], index: 2, kind: output, shape index: {}]  }
   0x1   :  { %8 = vsyncpa [#allocation6], 0 }
   0x2   :  { %9 = vsyncpa [#allocation4], 0  ;;  %s187_s9 = smov [#allocation2]   ;;  %s107_s13 = scalar_lea.hbm %s253_s0, 256 }
   0x3   :  { %s15_s10 = sshll.u32 %s187_s9, 4  ;;  %p108_p0 = scmp.ne.s32.totalorder %s253_s0, %s107_s13  ;;  %s16_s10 = int_to_ptr.vmem [resolvable:$true] %s15_s10 }
   0x4   :  { %p111_p1 = scmp.lt.u32.totalorder %s107_s13, %s253_s0 }
   0x6   :  { %p113_p2 = pnand %p111_p1, %p108_p0 }
   0x8   :  { %116 = shalt.err (!%p113_p2)
}
   0x9   :  { %s117_s18 = scalar_lea.vmem %s16_s10, 256  ;;  %p122_p4 = scmp.lt.s32.totalorder %s16_s10, %s16_s10 }
   0xa   :  { %p118_p3 = scmp.ne.s32.totalorder %s16_s10, %s117_s18  ;;  %p123_p5 = scmp.lt.s32.totalorder %s117_s18, %s117_s18 }
   0xc   :  { %p124_p6 = por %p123_p5, %p122_p4 }
   0xe   :  { %p125_p7 = pnand %p124_p6, %p118_p3 }
  0x10   :  { %128 = shalt.err (!%p125_p7)
}
  0x11   :  { %s188_s19 = smov 128   ;;  %s189_s20 = smov 8  }
  0x12   :  { %21 = dma.hbm_to_vmem [thread:$0]  %s253_s0, 256, %s16_s10, [#allocation3], %s188_s19, %s188_s19, %s189_s20  }
  0x13   :  { %s190_s23 = smov [#allocation5]   ;;  %s129_s27 = scalar_lea.hbm %s254_s1, 256 }
  0x14   :  { %s27_s24 = sshll.u32 %s190_s23, 4  ;;  %p130_p8 = scmp.ne.s32.totalorder %s254_s1, %s129_s27  ;;  %s28_s24 = int_to_ptr.vmem [resolvable:$true] %s27_s24 }
  0x15   :  { %p133_p9 = scmp.lt.u32.totalorder %s129_s27, %s254_s1 }
  0x17   :  { %p135_p10 = pnand %p133_p9, %p130_p8 }
  0x19   :  { %138 = shalt.err (!%p135_p10)
}
  0x1a   :  { %s139_s4 = scalar_lea.vmem %s28_s24, 256  ;;  %p144_p12 = scmp.lt.s32.totalorder %s28_s24, %s28_s24 }
  0x1b   :  { %p140_p11 = scmp.ne.s32.totalorder %s28_s24, %s139_s4  ;;  %p145_p13 = scmp.lt.s32.totalorder %s139_s4, %s139_s4 }
  0x1d   :  { %p146_p0 = por %p145_p13, %p144_p12 }
  0x1f   :  { %p147_p1 = pnand %p146_p0, %p140_p11 }
  0x21   :  { %150 = shalt.err (!%p147_p1)
}
  0x22   :  { %33 = dma.hbm_to_vmem [thread:$0]  %s254_s1, 256, %s28_s24, [#allocation6], %s188_s19, %s188_s19, %s189_s20  }
  0x23   :  { %177 = dma.done.wait [#allocation3], 256  }
  0x24   :  { %178 = vsyncadd [#allocation3], 4294967040 }
  0x25   :  { %179 = dma.done.wait [#allocation6], 256  }
  0x26   :  { %180 = vsyncadd [#allocation6], 4294967040  ;;  %v40_v0 = vld [vmem:[#allocation2] sm:$0xff]  ;;  %v41_v1 = vld [vmem:[#allocation2 + $0x8] sm:$0xff]  ;;  %s183_s6 = smov 0  }
  0x27 LB: > { %s49_s7 = scalar_lea.vmem [#allocation5], %s185_s6  ;;  %s191_s8 = smov 64   ;;  %vm59_vm0 = vcmask 523264   ;;  %s185_s6 = sphi %s183_s6, %s47_s6  }
  0x28   : > { %v92_v2 = vld [vmem:[%s49_s7] ss:$0 sm:$0xff]  ;;  %s91_s9 = sshll.u32 %s185_s6, 4  ;;  %s47_s6 = sadd.s32 1, %s185_s6  }
  0x29   : > { %56 = vrot.lane.b32.xlu0 %v92_v2, %s191_s8  ;;  %s62_s1 = scalar_lea.vmem [#allocation7], %s91_s9  ;;  %p44_p2 = scmp.ge.s32.totalorder %s47_s6, 16  }
  0x2a   :  { %s192_s10 = smov (%p44_p2), [#allocation7]  }
  0x2b   :  { %s70_s11 = sshll.u32 (%p44_p2), %s192_s10, 4  ;;  %s71_s11 = int_to_ptr.vmem [resolvable:$true] %s70_s11 }
  0x2c   :  { %s151_s12 = scalar_lea.vmem (%p44_p2), %s71_s11, 4096  ;;  %p156_p4 = scmp.lt.s32.totalorder (%p44_p2), %s71_s11, %s71_s11 }
  0x2d   :  { %p152_p3 = scmp.ne.s32.totalorder (%p44_p2), %s71_s11, %s151_s12  ;;  %p157_p5 = scmp.lt.s32.totalorder (%p44_p2), %s151_s12, %s151_s12 }
  0x2f   :  { %p158_p6 = por (%p44_p2), %p157_p5, %p156_p4 }
  0x31   :  { %p159_p7 = pnand (%p44_p2), %p158_p6, %p152_p3 }
  0x97   :  { %46 = sbr.rel (!%p44_p2) target bundleno = 39 (0x27), region = 45 }
  0x9b   : > { %v57_v3 = vpop.permute.xlu0 %56 }
  0x9c   : > { %v60_v4 = vsel %vm59_vm0, %v40_v0, %v57_v3  ;;  %v61_v5 = vsel %vm59_vm0, %v41_v1, %v57_v3 }
  0x9d   : > { %63 = vst [vmem:[%s62_s1] sm:$0xff] %v60_v4  ;;  %64 = vst [vmem:[%s62_s1 + $0x8] sm:$0xff] %v61_v5 }
  0x9e   :  { %162 = shalt.err (!%p159_p7)
}
  0x9f   :  { %s163_s15 = scalar_lea.hbm %s255_s2, 4096 }
  0xa0   :  { %p164_p8 = scmp.ne.s32.totalorder %s255_s2, %s163_s15  ;;  %p167_p9 = scmp.lt.u32.totalorder %s163_s15, %s255_s2 }
  0xa2   :  { %p169_p10 = pnand %p167_p9, %p164_p8 }
  0xa4   :  { %172 = shalt.err (!%p169_p10)
}
  0xa5   :  { %76 = dma.vmem_to_hbm [thread:$0]  %s71_s11, 4096, %s255_s2, [#allocation4], %s188_s19, %s188_s19, %s189_s20  }
  0xa6   :  { %181 = dma.done.wait [#allocation4], 4096  }
  0xa7   :  { %182 = vsyncadd [#allocation4], 4294963200 }
  0xa8   :  { %80 = vsyncpa [#allocation3], 1 }
  0xa9   :  { %81 = vsyncpa [#allocation6], 1 }
  0xaa   :  { %82 = vsyncpa [#allocation4], 1 }

</bundles_post_ra>
